<compile_context>
chip_gen: v7x
topology: tpu7x:2x2x1
jax: 0.10.0
libtpu: 0.0.40
codegen_flags: <defaults>
</compile_context>

<pallas_src>
import functools

import jax
import jax.numpy as jnp
from jax.experimental import pallas as pl
from jax.experimental.pallas import tpu as pltpu


def _round_up(x, m):
    return (x + m - 1) // m * m


def _supcon_kernel(q_ref, k_ref, selfcol_ref, rl_ref, cl_ref, npos_ref, out_ref,
                   m_scr, l_scr, pos_scr,
                   *, n_rows, n_cols, has_col_padding,
                   temperature, base_temperature):
    # q_ref: [bm, Dp] anchor rows (matmul dtype), already scaled by 1/temperature
    # k_ref: [bn, Dp] contrast rows (matmul dtype)
    # selfcol_ref: [bm, 1] i32 global anchor-row index (== its self-contrast column)
    # rl_ref: [bm, 1] i32 anchor labels, cl_ref: [1, bn] i32 contrast labels
    # npos_ref: [bm, 1] f32 precomputed positives-per-anchor (self excluded)
    # out_ref: [bm, 1] f32 per-anchor loss, written on the last contrast step
    j = pl.program_id(1)
    bm = q_ref.shape[0]
    bn = k_ref.shape[0]

    @pl.when(j == 0)
    def _():
        m_scr[...] = jnp.full_like(m_scr, -jnp.inf)
        l_scr[...] = jnp.zeros_like(l_scr)
        pos_scr[...] = jnp.zeros_like(pos_scr)

    # logits tile = q @ k.T on the MXU (bf16 x bf16 -> f32 accumulate by default).
    z = jax.lax.dot_general(q_ref[...], k_ref[...], (((1,), (1,)), ((), ())),
                            preferred_element_type=jnp.float32)      # [bm, bn] f32

    col_ids = j * bn + jax.lax.broadcasted_iota(jnp.int32, (bm, bn), 1)
    not_self = col_ids != selfcol_ref[...]            # (bm,1) broadcast vs (bm,bn)
    if has_col_padding:
        # Padded contrast columns only exist when n_pad > N (static), so this
        # compare is statically elided otherwise.
        den_ok = jnp.logical_and(not_self, col_ids < n_cols)
    else:
        den_ok = not_self

    # --- online logsumexp over valid, non-self contrast columns -----------------
    # NOTE: relies on every (valid row, contrast block) slice having >= 1 valid
    # column in block 0 (guaranteed for N >= 2 with bn >= 128); later all-masked
    # blocks are harmless because m_prev is already finite.
    z_den = jnp.where(den_ok, z, -jnp.inf)
    m_prev = m_scr[...]
    m_new = jnp.maximum(m_prev, jnp.max(z_den, axis=1, keepdims=True))
    alpha = jnp.exp(m_prev - m_new)                    # == 0 on the first block
    p = jnp.exp(z_den - m_new)                         # masked entries -> 0
    l_scr[...] = alpha * l_scr[...] + jnp.sum(p, axis=1, keepdims=True)
    m_scr[...] = m_new

    # --- positives: running sum of (scaled) logits -------------------------------
    # Padded rows/cols are excluded for free via sentinel labels (-2 / -1).
    pos = jnp.logical_and(rl_ref[...] == cl_ref[...], not_self)
    pos_scr[...] += jnp.sum(jnp.where(pos, z, 0.0), axis=1, keepdims=True)

    @pl.when(j == pl.num_programs(1) - 1)
    def _():
        # log_prob summed over positives = sum_pos(z) - npos * logsumexp(z)
        lse = m_scr[...] + jnp.log(l_scr[...])
        npos = npos_ref[...]
        # Exact divide kept here (once per row block, off the critical path) so
        # the f32 path stays bit-faithful to the reference.
        mean_log_prob_pos = pos_scr[...] / jnp.maximum(npos, 1.0) - lse
        loss_row = -(temperature / base_temperature) * mean_log_prob_pos
        valid = jnp.logical_and(selfcol_ref[...] < n_rows, npos > 0.0)
        out_ref[...] = jnp.where(valid, loss_row, 0.0)


def supcon_loss_pallas(features, labels=None, mask=None,
                       temperature=0.07, contrast_mode="all",
                       base_temperature=0.07,
                       block_m=512, block_n=512,
                       matmul_dtype=jnp.bfloat16):
    """JAX/Pallas equivalent of SupConLoss.forward (contrast_mode 'all' or 'one')."""
    features = jnp.asarray(features, jnp.float32)
    if features.ndim < 3:
        raise ValueError("`features` needs to be [bsz, n_views, ...]")
    if features.ndim > 3:
        features = features.reshape(features.shape[0], features.shape[1], -1)
    bsz, n_views, dim = features.shape

    if labels is not None and mask is not None:
        raise ValueError("Cannot define both `labels` and `mask`")
    if mask is not None:
        # TODO(synk): arbitrary precomputed `mask=` would need an N x N streamed
        # input; only the labels / identity paths are built in-kernel.
        raise NotImplementedError("explicit `mask` input is not supported")
    if labels is None:
        base_labels = jnp.arange(bsz, dtype=jnp.int32)   # eye(bsz) == same-sample
    else:
        base_labels = jnp.asarray(labels).reshape(-1).astype(jnp.int32)
        if base_labels.shape[0] != bsz:
            raise ValueError("Num of labels does not match num of features")

    # contrast_feature = cat(unbind(features, dim=1), dim=0) -> [n_views*bsz, D]
    contrast = jnp.transpose(features, (1, 0, 2)).reshape(n_views * bsz, dim)
    col_labels = jnp.tile(base_labels, n_views)          # label of each contrast row

    if contrast_mode == "all":
        anchor = contrast
        row_labels = col_labels
    elif contrast_mode == "one":
        anchor = contrast[:bsz]                          # == features[:, 0]
        row_labels = base_labels
    else:
        raise ValueError(f"Unknown mode: {contrast_mode}")

    M, N, D = anchor.shape[0], contrast.shape[0], dim

    # Per-anchor positive counts (self excluded), computed once in the wrapper.
    # O(bsz^2) label compare is negligible vs the O(M*N*D) kernel.
    same_sample = jnp.sum(
        (base_labels[:, None] == base_labels[None, :]).astype(jnp.int32), axis=1)
    npos_base = (n_views * same_sample - 1).astype(jnp.float32)
    npos_rows = jnp.tile(npos_base, n_views) if contrast_mode == "all" else npos_base

    # ---- tile selection ---------------------------------------------------------
    bm = min(block_m, _round_up(M, 8))
    # Guarantee >= 2 row blocks when M allows it, so the "parallel" row axis can
    # shard across v7x's two TensorCores (no-op on single-TC v5e/v6e).
    if M > 8 and _round_up(M, bm) == bm:
        bm = _round_up((M + 1) // 2, 8)
    bn = min(block_n, _round_up(N, 128))
    m_pad = _round_up(M, bm)
    n_pad = _round_up(N, bn)
    d_pad = _round_up(D, 128)
    grid = (m_pad // bm, n_pad // bn)
    has_col_padding = n_pad > N

    # ---- operands ---------------------------------------------------------------
    inv_t = jnp.float32(1.0 / temperature)
    q = jnp.pad(anchor * inv_t, ((0, m_pad - M), (0, d_pad - D))).astype(matmul_dtype)
    k = jnp.pad(contrast, ((0, n_pad - N), (0, d_pad - D))).astype(matmul_dtype)
    rl = jnp.pad(row_labels, (0, m_pad - M),
                 constant_values=-2).reshape(m_pad, 1).astype(jnp.int32)
    cl = jnp.pad(col_labels, (0, n_pad - N),
                 constant_values=-1).reshape(1, n_pad).astype(jnp.int32)
    selfcol = jnp.arange(m_pad, dtype=jnp.int32).reshape(m_pad, 1)
    npos_in = jnp.pad(npos_rows, (0, m_pad - M)).reshape(m_pad, 1).astype(jnp.float32)

    # ---- VMEM budget (double-buffered operand tiles + live (bm,bn) intermediates);
    #      capped at 64 MiB so the request is also safe on v7x. ---------------------
    dt_size = jnp.dtype(matmul_dtype).itemsize
    tile_bytes = 2 * (bm + bn) * d_pad * dt_size
    interm_bytes = 8 * bm * bn * 4
    small_bytes = 2 * (4 * bm + bn) * 4 + 3 * bm * 4 + (2 << 20)
    vmem_limit = int(min(max(tile_bytes + interm_bytes + small_bytes, 32 << 20),
                         64 << 20))

    kernel = functools.partial(
        _supcon_kernel,
        n_rows=M, n_cols=N, has_col_padding=has_col_padding,
        temperature=float(temperature),
        base_temperature=float(base_temperature),
    )

    per_row = pl.pallas_call(
        kernel,
        out_shape=jax.ShapeDtypeStruct((m_pad, 1), jnp.float32),
        grid=grid,
        in_specs=[
            pl.BlockSpec((bm, d_pad), lambda i, j: (i, 0)),   # anchor rows
            pl.BlockSpec((bn, d_pad), lambda i, j: (j, 0)),   # contrast rows
            pl.BlockSpec((bm, 1), lambda i, j: (i, 0)),       # self-contrast column
            pl.BlockSpec((bm, 1), lambda i, j: (i, 0)),       # anchor labels
            pl.BlockSpec((1, bn), lambda i, j: (0, j)),       # contrast labels
            pl.BlockSpec((bm, 1), lambda i, j: (i, 0)),       # positive counts
        ],
        out_specs=pl.BlockSpec((bm, 1), lambda i, j: (i, 0)),
        scratch_shapes=[
            pltpu.VMEM((bm, 1), jnp.float32),   # running max
            pltpu.VMEM((bm, 1), jnp.float32),   # running exp-sum
            pltpu.VMEM((bm, 1), jnp.float32),   # running sum of positive logits
        ],
        compiler_params=pltpu.CompilerParams(
            dimension_semantics=("parallel", "arbitrary"),
            vmem_limit_bytes=vmem_limit),
        cost_estimate=pl.CostEstimate(
            flops=2 * m_pad * n_pad * d_pad,
            transcendentals=m_pad * n_pad,
            bytes_accessed=dt_size * (m_pad * d_pad + grid[0] * n_pad * d_pad)
                           + 4 * (4 * m_pad + n_pad),
        ),
    )(q, k, selfcol, rl, cl, npos_in)

    # loss.view(anchor_count, batch_size).mean() == mean over all M anchors.
    return jnp.sum(per_row) / jnp.float32(M)


def supcon_loss_ref(features, labels, temperature=0.07, base_temperature=0.07,
                    contrast_mode="all"):
    """Pure-JAX reference mirroring the PyTorch forward."""
    bsz, n_views, dim = features.shape
    labels = labels.reshape(-1, 1)
    base_mask = (labels == labels.T).astype(jnp.float32)
    contrast = jnp.transpose(features, (1, 0, 2)).reshape(n_views * bsz, dim)
    if contrast_mode == "all":
        anchor, anchor_count = contrast, n_views
    else:
        anchor, anchor_count = features[:, 0], 1
    m = anchor_count * bsz
    n = n_views * bsz
    logits = jnp.dot(anchor, contrast.T) / temperature
    logits = logits - jnp.max(logits, axis=1, keepdims=True)
    logits_mask = jnp.ones((m, n), jnp.float32).at[jnp.arange(m), jnp.arange(m)].set(0.0)
    full_mask = jnp.tile(base_mask, (anchor_count, n_views)) * logits_mask
    exp_logits = jnp.exp(logits) * logits_mask
    log_prob = logits - jnp.log(jnp.sum(exp_logits, axis=1, keepdims=True))
    mean_log_prob_pos = jnp.sum(full_mask * log_prob, axis=1) / jnp.sum(full_mask, axis=1)
    loss = -(temperature / base_temperature) * mean_log_prob_pos
    return jnp.mean(loss)


if __name__ == "__main__":
    key = jax.random.PRNGKey(0)
    kf, kl = jax.random.split(key)

    bsz, n_views, dim = 8, 2, 32
    features = jax.random.normal(kf, (bsz, n_views, dim), dtype=jnp.float32)
    # L2-normalize features (standard for SupCon inputs)
    features = features / jnp.linalg.norm(features, axis=-1, keepdims=True)
    labels = jax.random.randint(kl, (bsz,), 0, 3)

    # --- f32 operands: bit-faithful check against the dense reference -----------
    loss_all_f32 = jax.block_until_ready(
        supcon_loss_pallas(features, labels=labels, matmul_dtype=jnp.float32))
    ref_all = jax.block_until_ready(supcon_loss_ref(features, labels))
    assert jnp.allclose(loss_all_f32, ref_all, atol=1e-3, rtol=1e-3), (loss_all_f32, ref_all)

    loss_one_f32 = jax.block_until_ready(
        supcon_loss_pallas(features, labels=labels, contrast_mode="one",
                           matmul_dtype=jnp.float32))
    ref_one = jax.block_until_ready(
        supcon_loss_ref(features, labels, contrast_mode="one"))
    assert jnp.allclose(loss_one_f32, ref_one, atol=1e-3, rtol=1e-3), (loss_one_f32, ref_one)

    # --- default bf16 operands: looser tolerance (rounding of the dot inputs) ---
    loss_all_bf16 = jax.block_until_ready(supcon_loss_pallas(features, labels=labels))
    assert jnp.allclose(loss_all_bf16, ref_all, atol=5e-2, rtol=2e-2), (loss_all_bf16, ref_all)

    loss_one_bf16 = jax.block_until_ready(
        supcon_loss_pallas(features, labels=labels, contrast_mode="one"))
    assert jnp.allclose(loss_one_bf16, ref_one, atol=5e-2, rtol=2e-2), (loss_one_bf16, ref_one)

    # --- labels=None (identity mask) path, equivalent to labels=arange(bsz) -----
    loss_id = jax.block_until_ready(supcon_loss_pallas(features, matmul_dtype=jnp.float32))
    ref_id = jax.block_until_ready(
        supcon_loss_ref(features, jnp.arange(bsz, dtype=jnp.int32)))
    assert jnp.allclose(loss_id, ref_id, atol=1e-3, rtol=1e-3), (loss_id, ref_id)

    print("KERNEL_OK")
</pallas_src>

<mosaic_0001>
module attributes {stable_mosaic.version = 11 : i64} {
  func.func @_supcon_kernel(%arg0: i32, %arg1: i32, %arg2: memref<8x128xf32, #tpu.memory_space<vmem>>, %arg3: memref<128x128xf32, #tpu.memory_space<vmem>>, %arg4: memref<8x1xi32, #tpu.memory_space<vmem>>, %arg5: memref<8x1xi32, #tpu.memory_space<vmem>>, %arg6: memref<1x128xi32, #tpu.memory_space<vmem>>, %arg7: memref<8x1xf32, #tpu.memory_space<vmem>>, %arg8: memref<8x1xf32, #tpu.memory_space<vmem>>, %arg9: memref<8x1xf32, #tpu.memory_space<vmem>>, %arg10: memref<8x1xf32, #tpu.memory_space<vmem>>, %arg11: memref<8x1xf32, #tpu.memory_space<vmem>>) attributes {dimension_semantics = [#tpu.dimension_semantics<parallel>, #tpu.dimension_semantics<arbitrary>], iteration_bounds = array<i64: 2, 1>, scalar_prefetch = 0 : i64, scratch_operands = 3 : i64, tpu.core_type = #tpu.core_type<tc>, window_params = [{transform_indices = @transform_0, window_bounds = array<i64: 8, 128>}, {transform_indices = @transform_1, window_bounds = array<i64: 128, 128>}, {transform_indices = @transform_2, window_bounds = array<i64: 8, 1>}, {transform_indices = @transform_3, window_bounds = array<i64: 8, 1>}, {transform_indices = @transform_4, window_bounds = array<i64: 1, 128>}, {transform_indices = @transform_5, window_bounds = array<i64: 8, 1>}, {transform_indices = @transform_6, window_bounds = array<i64: 8, 1>}]} {
    %c0_i32 = arith.constant 0 : i32
    %0 = arith.cmpi eq, %arg1, %c0_i32 : i32
    %1 = arith.extui %0 : i1 to i32
    %c0_i32_0 = arith.constant 0 : i32
    %2 = arith.cmpi ne, %1, %c0_i32_0 : i32
    scf.if %2 {
      %cst_29 = arith.constant 0xFF800000 : f32
      %50 = vector.broadcast %cst_29 : f32 to vector<8x1xf32>
      %c0_30 = arith.constant 0 : index
      %c0_31 = arith.constant 0 : index
      %51 = vector.load %arg9[%c0_30, %c0_31] : memref<8x1xf32, #tpu.memory_space<vmem>>, vector<8x1xf32>
      tpu.vector_store %arg9[%c0_30, %c0_31], %50 {strides = array<i32>} : memref<8x1xf32, #tpu.memory_space<vmem>>, vector<8x1xf32>,
      %cst_32 = arith.constant 0.000000e+00 : f32
      %52 = vector.broadcast %cst_32 : f32 to vector<8x1xf32>
      %c0_33 = arith.constant 0 : index
      %c0_34 = arith.constant 0 : index
      %53 = vector.load %arg10[%c0_33, %c0_34] : memref<8x1xf32, #tpu.memory_space<vmem>>, vector<8x1xf32>
      tpu.vector_store %arg10[%c0_33, %c0_34], %52 {strides = array<i32>} : memref<8x1xf32, #tpu.memory_space<vmem>>, vector<8x1xf32>,
      %cst_35 = arith.constant 0.000000e+00 : f32
      %54 = vector.broadcast %cst_35 : f32 to vector<8x1xf32>
      %c0_36 = arith.constant 0 : index
      %c0_37 = arith.constant 0 : index
      %55 = vector.load %arg11[%c0_36, %c0_37] : memref<8x1xf32, #tpu.memory_space<vmem>>, vector<8x1xf32>
      tpu.vector_store %arg11[%c0_36, %c0_37], %54 {strides = array<i32>} : memref<8x1xf32, #tpu.memory_space<vmem>>, vector<8x1xf32>,
    } else {
    }
    %c0 = arith.constant 0 : index
    %c0_1 = arith.constant 0 : index
    %3 = vector.load %arg2[%c0, %c0_1] : memref<8x128xf32, #tpu.memory_space<vmem>>, vector<8x128xf32>
    %c0_2 = arith.constant 0 : index
    %c0_3 = arith.constant 0 : index
    %4 = vector.load %arg3[%c0_2, %c0_3] : memref<128x128xf32, #tpu.memory_space<vmem>>, vector<128x128xf32>
    %cst = arith.constant dense<0.000000e+00> : vector<8x128xf32>
    %5 = tpu.matmul %3, %4, %cst {dimension_numbers = #tpu.dot_dimension_numbers<[1], [1], [0], [0], [0, 0, 1, 0], [], []>} : vector<8x128xf32>, vector<128x128xf32>, vector<8x128xf32> -> vector<8x128xf32>
    %c128_i32 = arith.constant 128 : i32
    %6 = arith.muli %arg1, %c128_i32 : i32
    %7 = tpu.iota {dimensions = array<i32: 1>} : vector<8x128xi32>
    %8 = vector.broadcast %6 : i32 to vector<8x128xi32>
    %9 = arith.addi %8, %7 : vector<8x128xi32>
    %c0_4 = arith.constant 0 : index
    %c0_5 = arith.constant 0 : index
    %10 = vector.load %arg4[%c0_4, %c0_5] : memref<8x1xi32, #tpu.memory_space<vmem>>, vector<8x1xi32>
    %11 = vector.broadcast %10 : vector<8x1xi32> to vector<8x128xi32>
    %12 = arith.cmpi ne, %9, %11 : vector<8x128xi32>
    %c16_i32 = arith.constant 16 : i32
    %13 = vector.broadcast %c16_i32 : i32 to vector<8x128xi32>
    %14 = arith.cmpi slt, %9, %13 : vector<8x128xi32>
    %15 = arith.andi %12, %14 : vector<8x128xi1>
    %cst_6 = arith.constant 0xFF800000 : f32
    %16 = vector.broadcast %cst_6 : f32 to vector<8x128xf32>
    %17 = arith.select %15, %5, %16 : vector<8x128xi1>, vector<8x128xf32>
    %c0_7 = arith.constant 0 : index
    %c0_8 = arith.constant 0 : index
    %18 = vector.load %arg9[%c0_7, %c0_8] : memref<8x1xf32, #tpu.memory_space<vmem>>, vector<8x1xf32>
    %cst_9 = arith.constant dense<0xFF800000> : vector<8xf32>
    %19 = vector.multi_reduction <maximumf>, %17, %cst_9 [1] : vector<8x128xf32> to vector<8xf32>
    %20 = vector.shape_cast %19 : vector<8xf32> to vector<8x1xf32>
    %21 = arith.maximumf %18, %20 : vector<8x1xf32>
    %22 = arith.subf %18, %21 : vector<8x1xf32>
    %23 = math.exp %22 : vector<8x1xf32>
    %24 = vector.broadcast %21 : vector<8x1xf32> to vector<8x128xf32>
    %25 = arith.subf %17, %24 : vector<8x128xf32>
    %26 = math.exp %25 : vector<8x128xf32>
    %c0_10 = arith.constant 0 : index
    %c0_11 = arith.constant 0 : index
    %27 = vector.load %arg10[%c0_10, %c0_11] : memref<8x1xf32, #tpu.memory_space<vmem>>, vector<8x1xf32>
    %28 = arith.mulf %23, %27 : vector<8x1xf32>
    %cst_12 = arith.constant dense<0.000000e+00> : vector<8xf32>
    %29 = vector.multi_reduction <add>, %26, %cst_12 [1] : vector<8x128xf32> to vector<8xf32>
    %30 = vector.shape_cast %29 : vector<8xf32> to vector<8x1xf32>
    %31 = arith.addf %28, %30 : vector<8x1xf32>
    %c0_13 = arith.constant 0 : index
    %c0_14 = arith.constant 0 : index
    %32 = vector.load %arg10[%c0_13, %c0_14] : memref<8x1xf32, #tpu.memory_space<vmem>>, vector<8x1xf32>
    tpu.vector_store %arg10[%c0_13, %c0_14], %31 {strides = array<i32>} : memref<8x1xf32, #tpu.memory_space<vmem>>, vector<8x1xf32>,
    %c0_15 = arith.constant 0 : index
    %c0_16 = arith.constant 0 : index
    %33 = vector.load %arg9[%c0_15, %c0_16] : memref<8x1xf32, #tpu.memory_space<vmem>>, vector<8x1xf32>
    tpu.vector_store %arg9[%c0_15, %c0_16], %21 {strides = array<i32>} : memref<8x1xf32, #tpu.memory_space<vmem>>, vector<8x1xf32>,
    %c0_17 = arith.constant 0 : index
    %c0_18 = arith.constant 0 : index
    %34 = vector.load %arg5[%c0_17, %c0_18] : memref<8x1xi32, #tpu.memory_space<vmem>>, vector<8x1xi32>
    %c0_19 = arith.constant 0 : index
    %c0_20 = arith.constant 0 : index
    %35 = vector.load %arg6[%c0_19, %c0_20] : memref<1x128xi32, #tpu.memory_space<vmem>>, vector<1x128xi32>
    %36 = vector.broadcast %34 : vector<8x1xi32> to vector<8x128xi32>
    %37 = vector.broadcast %35 : vector<1x128xi32> to vector<8x128xi32>
    %38 = arith.cmpi eq, %36, %37 : vector<8x128xi32>
    %39 = arith.andi %38, %12 : vector<8x128xi1>
    %c0_21 = arith.constant 0 : index
    %c0_22 = arith.constant 0 : index
    %40 = vector.load %arg11[%c0_21, %c0_22] : memref<8x1xf32, #tpu.memory_space<vmem>>, vector<8x1xf32>
    %cst_23 = arith.constant 0.000000e+00 : f32
    %41 = vector.broadcast %cst_23 : f32 to vector<8x128xf32>
    %42 = arith.select %39, %5, %41 : vector<8x128xi1>, vector<8x128xf32>
    %cst_24 = arith.constant dense<0.000000e+00> : vector<8xf32>
    %43 = vector.multi_reduction <add>, %42, %cst_24 [1] : vector<8x128xf32> to vector<8xf32>
    %44 = vector.shape_cast %43 : vector<8xf32> to vector<8x1xf32>
    %45 = arith.addf %40, %44 : vector<8x1xf32>
    %c0_25 = arith.constant 0 : index
    %c0_26 = arith.constant 0 : index
    %46 = vector.load %arg11[%c0_25, %c0_26] : memref<8x1xf32, #tpu.memory_space<vmem>>, vector<8x1xf32>
    tpu.vector_store %arg11[%c0_25, %c0_26], %45 {strides = array<i32>} : memref<8x1xf32, #tpu.memory_space<vmem>>, vector<8x1xf32>,
    %c0_i32_27 = arith.constant 0 : i32
    %47 = arith.cmpi eq, %arg1, %c0_i32_27 : i32
    %48 = arith.extui %47 : i1 to i32
    %c0_i32_28 = arith.constant 0 : i32
    %49 = arith.cmpi ne, %48, %c0_i32_28 : i32
    scf.if %49 {
      %c0_29 = arith.constant 0 : index
      %c0_30 = arith.constant 0 : index
      %50 = vector.load %arg9[%c0_29, %c0_30] : memref<8x1xf32, #tpu.memory_space<vmem>>, vector<8x1xf32>
      %c0_31 = arith.constant 0 : index
      %c0_32 = arith.constant 0 : index
      %51 = vector.load %arg10[%c0_31, %c0_32] : memref<8x1xf32, #tpu.memory_space<vmem>>, vector<8x1xf32>
      %52 = math.log %51 : vector<8x1xf32>
      %53 = arith.addf %50, %52 : vector<8x1xf32>
      %c0_33 = arith.constant 0 : index
      %c0_34 = arith.constant 0 : index
      %54 = vector.load %arg7[%c0_33, %c0_34] : memref<8x1xf32, #tpu.memory_space<vmem>>, vector<8x1xf32>
      %c0_35 = arith.constant 0 : index
      %c0_36 = arith.constant 0 : index
      %55 = vector.load %arg11[%c0_35, %c0_36] : memref<8x1xf32, #tpu.memory_space<vmem>>, vector<8x1xf32>
      %cst_37 = arith.constant 1.000000e+00 : f32
      %56 = vector.broadcast %cst_37 : f32 to vector<8x1xf32>
      %57 = arith.maximumf %54, %56 : vector<8x1xf32>
      %58 = arith.divf %55, %57 : vector<8x1xf32>
      %59 = arith.subf %58, %53 : vector<8x1xf32>
      %cst_38 = arith.constant -1.000000e+00 : f32
      %60 = vector.broadcast %cst_38 : f32 to vector<8x1xf32>
      %61 = arith.mulf %60, %59 : vector<8x1xf32>
      %c0_39 = arith.constant 0 : index
      %c0_40 = arith.constant 0 : index
      %62 = vector.load %arg4[%c0_39, %c0_40] : memref<8x1xi32, #tpu.memory_space<vmem>>, vector<8x1xi32>
      %c16_i32_41 = arith.constant 16 : i32
      %63 = vector.broadcast %c16_i32_41 : i32 to vector<8x1xi32>
      %64 = arith.cmpi slt, %62, %63 : vector<8x1xi32>
      %cst_42 = arith.constant 0.000000e+00 : f32
      %65 = vector.broadcast %cst_42 : f32 to vector<8x1xf32>
      %66 = arith.cmpf ogt, %54, %65 : vector<8x1xf32>
      %67 = arith.andi %64, %66 : vector<8x1xi1>
      %cst_43 = arith.constant 0.000000e+00 : f32
      %68 = vector.broadcast %cst_43 : f32 to vector<8x1xf32>
      %69 = arith.select %67, %61, %68 : vector<8x1xi1>, vector<8x1xf32>
      %c0_44 = arith.constant 0 : index
      %c0_45 = arith.constant 0 : index
      %70 = vector.load %arg8[%c0_44, %c0_45] : memref<8x1xf32, #tpu.memory_space<vmem>>, vector<8x1xf32>
      tpu.vector_store %arg8[%c0_44, %c0_45], %69 {strides = array<i32>} : memref<8x1xf32, #tpu.memory_space<vmem>>, vector<8x1xf32>,
    } else {
    }
    return
  }
  func.func @transform_0(%arg0: i32, %arg1: i32) -> (i32, i32) {
    %c0_i32 = arith.constant 0 : i32
    %c0_i32_0 = arith.constant 0 : i32
    return %arg0, %c0_i32 : i32, i32
  }
  func.func @transform_1(%arg0: i32, %arg1: i32) -> (i32, i32) {
    %c0_i32 = arith.constant 0 : i32
    %c0_i32_0 = arith.constant 0 : i32
    return %arg1, %c0_i32 : i32, i32
  }
  func.func @transform_2(%arg0: i32, %arg1: i32) -> (i32, i32) {
    %c0_i32 = arith.constant 0 : i32
    %c0_i32_0 = arith.constant 0 : i32
    return %arg0, %c0_i32 : i32, i32
  }
  func.func @transform_3(%arg0: i32, %arg1: i32) -> (i32, i32) {
    %c0_i32 = arith.constant 0 : i32
    %c0_i32_0 = arith.constant 0 : i32
    return %arg0, %c0_i32 : i32, i32
  }
  func.func @transform_4(%arg0: i32, %arg1: i32) -> (i32, i32) {
    %c0_i32 = arith.constant 0 : i32
    %c0_i32_0 = arith.constant 0 : i32
    return %c0_i32, %arg1 : i32, i32
  }
  func.func @transform_5(%arg0: i32, %arg1: i32) -> (i32, i32) {
    %c0_i32 = arith.constant 0 : i32
    %c0_i32_0 = arith.constant 0 : i32
    return %arg0, %c0_i32 : i32, i32
  }
  func.func @transform_6(%arg0: i32, %arg1: i32) -> (i32, i32) {
    %c0_i32 = arith.constant 0 : i32
    %c0_i32_0 = arith.constant 0 : i32
    return %arg0, %c0_i32 : i32, i32
  }
}

</mosaic_0001>

<bundles_post_ra>
// kernel: tpu_custom_call.1
= control target key start
LH: loop header
LB: loop body
LE: loop exit
PB: predicated region body
PF: predicated region fallthrough
CT: control target
= control target key end

     0   :  { %11 = vsyncpa [#allocation6], 0  ;;  %s884_s21 = smov 0   ;;  %s886_s22 = smov 0   ;;  %s992_s0 = inlined_call_operand.vmem [shape: f32[16,128], index: 0, kind: input, shape index: {}]   ;;  %s993_s1 = inlined_call_operand.hbm [shape: f32[128,128], index: 1, kind: input, shape index: {}]   ;;  %s994_s2 = inlined_call_operand.vmem [shape: s32[16,1], index: 2, kind: input, shape index: {}]   ;;  %s995_s3 = inlined_call_operand.vmem [shape: s32[16,1], index: 3, kind: input, shape index: {}]   ;;  %s996_s4 = inlined_call_operand.vmem [shape: s32[1,128], index: 4, kind: input, shape index: {}]   ;;  %s997_s5 = inlined_call_operand.vmem [shape: f32[16,1], index: 5, kind: input, shape index: {}]   ;;  %s998_s6 = inlined_call_operand.vmem [shape: f32[16,1], index: 6, kind: output, shape index: {}]  }
   0x1   :  { %s888_s23 = smov 0  }
   0x2 LB: > { %s641_s24 = sadd.s32 4294967295, %s839_s23   ;;  %s29_s25 = sadd.s32 1, %s835_s22  ;;  %s839_s23 = sphi %s888_s23, %s17_s23   ;;  %s835_s22 = sphi %s886_s22, %s1008_s22   ;;  %s831_s21 = sphi %s884_s21, %s1007_s21  }
   0x3   : > { %p31_p0 = scmp.ge.s32.totalorder %s29_s25, 2  ;;  %p643_p1 = scmp.ge.s32.totalorder %s839_s23, 1 }
   0x4   : > { %p216_p2 = scmp.lt.s32.totalorder %s839_s23, 3  ;;  %p909_p4 = scmp.eq.s32.totalorder %s641_s24, 0 }
   0x5   : > { %s1010_s25 = smov (%p31_p0, %s29_s25), 0  ;;  %s841_s28 = smov [#allocation5]  }
   0x6   : > { %p905_p3 = pnand %p643_p1, %p216_p2  ;;  %s231_s29 = sshll.u32 %s841_s28, 4  ;;  %s232_s29 = int_to_ptr.vmem [resolvable:$true] %s231_s29 }
   0x7   : > { %s1003_s27 = scalar_select %p909_p4, 1, 0 }
   0x8   : > { %s1002_s26 = scalar_select %p905_p3, 1, 0 }
   0x9   : > { %p737_p5 = pneg %p905_p3  ;;  %s785_s9 = scalar_lea.hbm %s993_s1, 2048 }
   0xa   : > { %p786_p7 = scmp.ne.s32.totalorder %s993_s1, %s785_s9  ;;  %p792_p11 = scmp.lt.u32.totalorder %s785_s9, %s993_s1 }
   0xb   : > { %p917_p6 = pnand %p909_p4, %p737_p5 }
   0xd   : > { %p787_p8 = pneg %p917_p6 }
   0xf   : > { %p788_p9 = pnand %p787_p8, %p786_p7 }
  0x11   : > { %p789_p10 = pneg %p788_p9 }
  0x13   : > { %p794_p12 = pnand %p792_p11, %p789_p10 }
  0x15   : > { %797 = shalt.err (!%p794_p12)
}
  0x16   : > { %s798_s14 = scalar_lea.vmem %s232_s29, 2048  ;;  %p806_p2 = scmp.lt.s32.totalorder %s232_s29, %s232_s29 }
  0x17   : > { %p799_p13 = scmp.ne.s32.totalorder %s232_s29, %s798_s14  ;;  %p807_p5 = scmp.lt.s32.totalorder %s798_s14, %s798_s14 }
  0x19   : > { %p801_p0 = pnand %p799_p13, %p787_p8  ;;  %p808_p4 = por %p807_p5, %p806_p2 }
  0x1b   : > { %p802_p1 = pneg %p801_p0 }
  0x1d   : > { %p809_p3 = pnand %p808_p4, %p802_p1 }
  0x1f   : > { %812 = shalt.err (!%p809_p3)
}
  0x20   : > { %s842_s15 = smov 128   ;;  %s843_s16 = smov 8  }
  0x21   : > { %740 = dma.hbm_to_vmem [thread:$0]  (!%p917_p6), %s993_s1, 2048, %s232_s29, [#allocation6], %s842_s15, %s842_s15, %s843_s16  }
  0x22   : > { %p1005_p7 = scmp.ne.s32.totalorder %s1002_s26, 0 }
  0x23   : > { %p1006_p9 = scmp.ne.s32.totalorder (!%p1005_p7), %s1003_s27, 0 }
  0x24   : > { %281 = sbr.rel (%p1005_p7) target bundleno = 784 (0x310), region = 44 }
  0x2b   : > { %826 = dma.done.wait (%p1006_p9), [#allocation6], 2048  }
  0x2c   : > { %828 = vsyncadd (%p1006_p9), [#allocation6], 4294965248  ;;  %vm352_vm0 = vcmask 7168   ;;  %v844_v0 = vmov 0.0|0.0   ;;  %v845_v1 = vmov 0.0   ;;  %vm846_vm1 = vmmov 0  }
  0x2d   : > { %709 = vmatprep.subr.bf16.mxu0 %v844_v0  ;;  %354 = vst.msk [vmem:[#allocation3] sm:$0xff] %vm352_vm0, %v845_v1  ;;  %355 = vst.msk [vmem:[#allocation4] sm:$0xff] %vm352_vm0, %v845_v1  ;;  %706 = vmatprep.mubr.msk.f32.mxu0 %vm846_vm1, %v845_v1  ;;  %p324_p3 = scmp.lt.s32.totalorder %s831_s21, 1  ;;  %v847_v2 = vmov 0   ;;  %v357_v3 = vld [vmem:[#allocation5] sm:$0xff]  ;;  %v358_v4 = vld [vmem:[#allocation5 + $0x8] sm:$0xff]  ;;  %v444_v30 = vlaneseq }
  0x2e   : > { %775 = vset.pattern.permute.xlu0 %v847_v2  ;;  %776 = vset.pattern.permute.xlu1 %v847_v2  ;;  %v710_v5 = vpack.c.bf16 %v358_v4, %v357_v3  ;;  %v359_v6 = vld [vmem:[#allocation5 + $0x10] sm:$0xff]  ;;  %v360_v7 = vld [vmem:[#allocation5 + $0x18] sm:$0xff]  ;;  %v361_v10 = vld [vmem:[#allocation5 + $0x20] sm:$0xff]  ;;  %v848_v29 = vmov -inf  }
  0x2f   : > { %s1012_s21 = smov (!%p324_p3, %s831_s21), 1  ;;  %v713_v9 = vpack.c.bf16 %v360_v7, %v359_v6  ;;  %v362_v11 = vld [vmem:[#allocation5 + $0x28] sm:$0xff]  ;;  %v363_v13 = vld [vmem:[#allocation5 + $0x30] sm:$0xff]  ;;  %v364_v14 = vld [vmem:[#allocation5 + $0x38] sm:$0xff]  ;;  %353 = vst.msk [vmem:[#allocation2] sm:$0xff] %vm352_vm0, %v848_v29  ;;  %v445_v31 = vand.u32 127, %v444_v30 }
  0x30   : > { %s947_s19 = sshll.u32 %s1012_s21, 3  ;;  %711 = vmatpush3.bf16.xpose.msra.mxu0 %v710_v5  ;;  %v716_v12 = vpack.c.bf16 %v362_v11, %v361_v10  ;;  %v719_v15 = vpack.c.bf16 %v364_v14, %v363_v13  ;;  %v365_v16 = vld [vmem:[#allocation5 + $0x40] sm:$0xff]  ;;  %v366_v17 = vld [vmem:[#allocation5 + $0x48] sm:$0xff]  ;;  %v367_v19 = vld [vmem:[#allocation5 + $0x50] sm:$0xff] }
  0x31   : > { %s332_s26 = scalar_lea.vmem %s994_s2, %s947_s19  ;;  %712 = vmatprep.subr.bf16.mxu0 %v844_v0  ;;  %v722_v18 = vpack.c.bf16 %v366_v17, %v365_v16  ;;  %v368_v20 = vld [vmem:[#allocation5 + $0x58] sm:$0xff]  ;;  %v369_v22 = vld [vmem:[#allocation5 + $0x60] sm:$0xff]  ;;  %v370_v23 = vld [vmem:[#allocation5 + $0x68] sm:$0xff]  ;;  %s327_s28 = scalar_lea.vmem %s992_s0, %s947_s19  ;;  %vm453_vm3 = vcmp.lt.s32.totalorder %v445_v31, 16 }
  0x32   : > { %v953_v8 = vld [vmem:[%s332_s26] sm:$0xff]  ;;  %v725_v21 = vpack.c.bf16 %v368_v20, %v367_v19  ;;  %v728_v24 = vpack.c.bf16 %v370_v23, %v369_v22  ;;  %v371_v25 = vld [vmem:[#allocation5 + $0x70] sm:$0xff]  ;;  %v372_v26 = vld [vmem:[#allocation5 + $0x78] sm:$0xff]  ;;  %s336_s7 = scalar_lea.vmem %s995_s3, %s947_s19  ;;  %s343_s12 = scalar_lea.vmem %s997_s5, %s947_s19 }
  0x33   : > { %450 = vperm.xlu0 %775, %v953_v8   ;;  %v731_v27 = vpack.c.bf16 %v372_v26, %v371_v25  ;;  %v356_v28 = vld [vmem:[%s327_s28] sm:$0xff]  ;;  %vm512_vm7 = vcmp.lt.s32.totalorder %v953_v8, 16  ;;  %s347_s15 = scalar_lea.vmem %s998_s6, %s947_s19 }
  0x34   : > { %v479_v40 = vld [vmem:[%s336_s7] sm:$0xff]  ;;  %v490_v49 = vld [vmem:[#allocation4] sm:$0xff]  ;;  %v471_v53 = vld [vmem:[#allocation3] sm:$0xff] }
  0x35   : > { %v654_v43 = vld [vmem:[%s996_s4] ss:$0 sm:$0xff] }
  0x36   : > { %v456_v36 = vld [vmem:[#allocation2] sm:$0xff] }
  0x37   : > { %v504_v57 = vld [vmem:[%s343_s12] sm:$0xff] }
  0x38   : > { %714 = vmatpush3.bf16.xpose.msra.mxu0 %v713_v9  ;;  %v506_v58 = vmax.f32 %v504_v57, 1.0  ;;  %vm513_vm8 = vcmp.gt.f32.partialorder %v504_v57, 0.0 }
  0x39   : > { %715 = vmatprep.subr.bf16.mxu0 %v844_v0  ;;  %vm514_vm9 = vmand %vm512_vm7, %vm513_vm8 }
  0x40   : > { %717 = vmatpush3.bf16.xpose.msra.mxu0 %v716_v12 }
  0x41   : > { %718 = vmatprep.subr.bf16.mxu0 %v844_v0 }
  0x48   : > { %720 = vmatpush3.bf16.xpose.msra.mxu0 %v719_v15 }
  0x49   : > { %721 = vmatprep.subr.bf16.mxu0 %v844_v0 }
  0x50   : > { %723 = vmatpush3.bf16.xpose.msra.mxu0 %v722_v18 }
  0x51   : > { %724 = vmatprep.subr.bf16.mxu0 %v844_v0 }
  0x58   : > { %726 = vmatpush3.bf16.xpose.msra.mxu0 %v725_v21 }
  0x59   : > { %727 = vmatprep.subr.bf16.mxu0 %v844_v0 }
  0x60   : > { %729 = vmatpush3.bf16.xpose.msra.mxu0 %v728_v24 }
  0x61   : > { %730 = vmatprep.subr.bf16.mxu0 %v844_v0 }
  0x68   : > { %732 = vmatpush3.bf16.xpose.msra.mxu0 %v731_v27 }
  0x6f   : > { %707 = vmatmul.mubr.f32.vlgmr.msra.gmra.mrb[0].mxu0 %v356_v28 }
  0xb2   : > { %v451_v32 = vpop.permute.xlu0 %450 }
  0xb3   : > { %vm452_vm2 = vcmp.ne.s32.totalorder %v445_v31, %v451_v32 }
  0xb4   : > { %vm454_vm4 = vmand %vm452_vm2, %vm453_vm3 }
 0x142   : > { %v439_v33 = vpop.f32.mrb[0].mxu0 }
 0x143   : > { %v708_v34 = vpop.f32.mrb[1].mxu0  ;;  %v455_v35 = vsel %vm454_vm4, %v439_v33, -inf }
 0x144   : > { %457 = vmax.xlane.f32.xlu0 %v455_v35 }
 0x1d1   : > { %v458_v37 = vpop.xlane.xlu0 %457 }
 0x1d2   : > { %v459_v38 = vmax.f32 %v456_v36, %v458_v37 }
 0x1d4   : > { %v460_v39 = vsub.f32 %v456_v36, %v459_v38  ;;  %478 = vst.msk [vmem:[#allocation2] sm:$0xff] %vm352_vm0, %v459_v38  ;;  %465 = vperm.xlu1 %776, %v459_v38  }
 0x1d6   : > { %v461_v48 = vmul.f32 1.442695, %v460_v39 }
 0x1d8   : > { %482 = vperm.xlu1 %776, %v479_v40  }
 0x1db   : > { %v499_v0 = vld [vmem:[#allocation2] sm:$0xff] }
 0x253   : > { %v466_v41 = vpop.permute.xlu1 %465 }
 0x254   : > { %v468_v42 = vsub.f32 %v455_v35, %v466_v41 }
 0x256   : > { %v469_v44 = vmul.f32 1.442695, %v468_v42 }
 0x257   : > { %v483_v45 = vpop.permute.xlu1 %482 }
 0x258   : > { %777 = vpow2.f32 %v469_v44  ;;  %vm488_vm5 = vcmp.eq.s32.totalorder %v483_v45, %v654_v43 }
 0x259   : > { %vm489_vm6 = vmand %vm488_vm5, %vm452_vm2  ;;  %779 = vpow2.f32 %v461_v48 }
 0x25a   : > { %v491_v46 = vsel %vm489_vm6, %v439_v33, 0.0  ;;  %781 = vrcp.f32 %v506_v58 }
 0x25b   : > { %492 = vadd.xlane.f32.xlu0 %v491_v46 }
 0x262   : > { %v778_v47 = vpop.eup %777 }
 0x263   : > { %473 = vadd.xlane.f32.xlu1 %v778_v47  ;;  %v780_v52 = vpop.eup %779 }
 0x264   : > { %v472_v54 = vmul.f32 %v780_v52, %v471_v53  ;;  %v782_v60 = vpop.eup %781 }
 0x2e8   : > { %v493_v50 = vpop.xlane.xlu0 %492 }
 0x2e9   : > { %v494_v51 = vadd.f32 %v493_v50, %v490_v49 }
 0x2eb   : > { %495 = vst.msk [vmem:[#allocation4] sm:$0xff] %vm352_vm0, %v494_v51 }
 0x2f0   : > { %v474_v55 = vpop.xlane.xlu1 %473 }
 0x2f1   : > { %v475_v56 = vadd.f32 %v474_v55, %v472_v54 }
 0x2f2   : > { %v505_v62 = vld [vmem:[#allocation4] sm:$0xff] }
 0x2f3   : > { %477 = vst.msk [vmem:[#allocation3] sm:$0xff] %vm352_vm0, %v475_v56  ;;  %v508_v1 = vmul.f32 %v782_v60, %v505_v62 }
 0x2fa   : > { %v500_v59 = vld [vmem:[#allocation3] sm:$0xff] }
 0x2fb   : > { %783 = vlog2.f32 %v500_v59 }
 0x305   : > { %v784_v61 = vpop.eup %783 }
 0x306   : > { %v502_v63 = vmul.f32 0.6931472, %v784_v61 }
 0x308   : > { %v503_v2 = vadd.f32 %v502_v63, %v499_v0 }
 0x30a   : > { %v509_v3 = vsub.f32 %v508_v1, %v503_v2 }
 0x30c   : > { %v510_v4 = vmul.f32 -1.0, %v509_v3 }
 0x30e   : > { %v515_v5 = vsel %vm514_vm9, %v510_v4, 0.0 }
 0x30f   : > { %516 = vst.msk [vmem:[%s347_s15] sm:$0xff] %vm352_vm0, %v515_v5 }
 0x310 PF: > { %s17_s23 = sadd.s32 1, %s839_s23   ;;  %s1007_s21 = smov %s835_s22 }
 0x311   : > { %p14_p4 = scmp.ge.s32.totalorder %s17_s23, 4   ;;  %s1008_s22 = smov %s1010_s25 }
 0x313   :  { %16 = sbr.rel (!%p14_p4) target bundleno = 2 (0x2), region = 100 }
 0x31a   :  { %536 = vsyncpa [#allocation6], 1 }
 0x31b   :  { %538 = vsyncpa [#allocation6 + $0x1], 1 }

</bundles_post_ra>
